<compile_context>
chip_gen: v7x
topology: tpu7x:2x2x1
jax: 0.10.0
libtpu: 0.0.40
codegen_flags: <defaults>
</compile_context>

<pallas_src>
import functools

import jax
import jax.numpy as jnp
from jax.experimental import pallas as pl
from jax.experimental.pallas import tpu as pltpu


def _round_up(x, m):
    return ((x + m - 1) // m) * m


def _focal_loss_kernel(gamma, logits_ref, targets_ref, alpha_ref, loss_ref):
    # logits_ref: (C, TN), targets_ref: (1, TN) int32, alpha_ref: (C, 1)
    x = logits_ref[...].astype(jnp.float32)                 # (C, TN)
    c, tn = x.shape
    t = targets_ref[...]                                    # (1, TN) int32

    # Numerically stable log-softmax along the class axis (axis=0).
    m = jnp.max(x, axis=0, keepdims=True)                   # (1, TN)
    lse = m + jnp.log(jnp.sum(jnp.exp(x - m), axis=0, keepdims=True))  # (1, TN)

    # One-hot class mask (scatter_ equivalent), classes on sublanes.
    row = jax.lax.broadcasted_iota(jnp.int32, (c, tn), 0)   # (C, TN)
    mask = (row == t).astype(jnp.float32)                   # (C, TN)

    # Target-class logit and log-probability.
    x_t = jnp.sum(mask * x, axis=0, keepdims=True)          # (1, TN)
    log_p = x_t - lse                                       # (1, TN)
    p_t = jnp.exp(log_p)                                    # (1, TN)

    # alpha[targets] gathered through the same one-hot mask.
    alpha_col = alpha_ref[...].astype(jnp.float32)          # (C, 1)
    alpha_t = jnp.sum(mask * alpha_col, axis=0, keepdims=True)  # (1, TN)

    one_minus = jnp.maximum(1.0 - p_t, 0.0)
    g = float(gamma)
    if g == int(g) and 0 <= int(g) <= 4:
        # integer gamma (default 2): cheap repeated multiply on the VPU
        w = jnp.ones_like(one_minus)
        for _ in range(int(g)):
            w = w * one_minus
    else:
        w = jnp.power(one_minus, g)

    # Per-sample focal loss; padded columns (alpha_t == 0) contribute exactly 0.
    loss_ref[...] = -alpha_t * w * log_p                    # (1, TN)


def focal_loss(logits, targets, alpha_vec, gamma=2.0, block_n=512):
    """logits: (N, C) float, targets: (N,) int, alpha_vec: (C,) float. Returns scalar sum."""
    n, c = logits.shape

    # Lane tile over the batch: multiple of 128, capped at block_n.
    tn = min(block_n, _round_up(n, 128))
    n_pad = _round_up(n, tn)
    grid = pl.cdiv(n_pad, tn)

    # Transposed, lane-dense layout: (C, N_pad) with zero padding; padded targets = -1.
    logits_t = jnp.zeros((c, n_pad), dtype=logits.dtype).at[:, :n].set(logits.T)
    targets_row = (
        jnp.full((1, n_pad), -1, dtype=jnp.int32).at[0, :n].set(targets.astype(jnp.int32))
    )
    alpha_col = alpha_vec.reshape(c, 1).astype(jnp.float32)

    kernel = functools.partial(_focal_loss_kernel, float(gamma))

    per_sample = pl.pallas_call(
        kernel,
        out_shape=jax.ShapeDtypeStruct((1, n_pad), jnp.float32),
        grid=(grid,),
        in_specs=[
            pl.BlockSpec((c, tn), lambda i: (0, i)),   # logits tile (classes x batch)
            pl.BlockSpec((1, tn), lambda i: (0, i)),   # targets tile
            pl.BlockSpec((c, 1), lambda i: (0, 0)),    # alpha (resident every step)
        ],
        out_specs=pl.BlockSpec((1, tn), lambda i: (0, i)),
        compiler_params=pltpu.CompilerParams(dimension_semantics=("parallel",)),
    )(logits_t, targets_row, alpha_col)

    # size_average=False -> sum over the batch (padded entries are exact zeros).
    return jnp.sum(per_sample)


def focal_loss_ref(logits, targets, alpha_vec, gamma=2.0):
    p = jax.nn.softmax(logits.astype(jnp.float32), axis=1)
    probs = jnp.take_along_axis(p, targets.reshape(-1, 1), axis=1)
    alpha_t = alpha_vec[targets].reshape(-1, 1)
    batch_loss = -alpha_t * jnp.power(1.0 - probs, gamma) * jnp.log(probs)
    return jnp.sum(batch_loss)


if __name__ == "__main__":
    class_num = 30
    alpha_scalar = 0.25
    gamma = 2.0
    N = 8

    key = jax.random.PRNGKey(0)
    k1, k2 = jax.random.split(key)
    logits = jax.random.normal(k1, (N, class_num), dtype=jnp.float32)
    targets = jax.random.randint(k2, (N,), 0, class_num, dtype=jnp.int32)

    # alpha parameter: torch.ones(class_num, 1) * 0.25 -> (C,) here
    alpha_vec = jnp.ones((class_num,), dtype=jnp.float32) * alpha_scalar

    loss = focal_loss(logits, targets, alpha_vec, gamma=gamma)
    loss = jax.block_until_ready(loss)

    ref = focal_loss_ref(logits, targets, alpha_vec, gamma=gamma)
    assert jnp.allclose(loss, ref, rtol=1e-5, atol=1e-5), (loss, ref)

    print("KERNEL_OK")
</pallas_src>

<mosaic_0001>
module attributes {stable_mosaic.version = 11 : i64} {
  func.func @_focal_loss_kernel(%arg0: i32, %arg1: memref<30x128xf32, #tpu.memory_space<vmem>>, %arg2: memref<1x128xi32, #tpu.memory_space<vmem>>, %arg3: memref<30x1xf32, #tpu.memory_space<vmem>>, %arg4: memref<1x128xf32, #tpu.memory_space<vmem>>) attributes {dimension_semantics = [#tpu.dimension_semantics<parallel>], iteration_bounds = array<i64: 1>, scalar_prefetch = 0 : i64, scratch_operands = 0 : i64, tpu.core_type = #tpu.core_type<tc>, window_params = [{transform_indices = @transform_0, window_bounds = array<i64: 30, 128>}, {transform_indices = @transform_1, window_bounds = array<i64: 1, 128>}, {pipeline_mode = #tpu.pipeline_mode<synchronous>, transform_indices = @transform_2, window_bounds = array<i64: 30, 1>}, {transform_indices = @transform_3, window_bounds = array<i64: 1, 128>}]} {
    %c0 = arith.constant 0 : index
    %c0_0 = arith.constant 0 : index
    %0 = vector.load %arg1[%c0, %c0_0] : memref<30x128xf32, #tpu.memory_space<vmem>>, vector<30x128xf32>
    %c0_1 = arith.constant 0 : index
    %c0_2 = arith.constant 0 : index
    %1 = vector.load %arg2[%c0_1, %c0_2] : memref<1x128xi32, #tpu.memory_space<vmem>>, vector<1x128xi32>
    %cst = arith.constant dense<0xFF800000> : vector<128xf32>
    %2 = vector.multi_reduction <maximumf>, %0, %cst [0] : vector<30x128xf32> to vector<128xf32>
    %3 = vector.shape_cast %2 : vector<128xf32> to vector<1x128xf32>
    %4 = vector.broadcast %3 : vector<1x128xf32> to vector<30x128xf32>
    %5 = arith.subf %0, %4 : vector<30x128xf32>
    %6 = math.exp %5 : vector<30x128xf32>
    %cst_3 = arith.constant dense<0.000000e+00> : vector<128xf32>
    %7 = vector.multi_reduction <add>, %6, %cst_3 [0] : vector<30x128xf32> to vector<128xf32>
    %8 = vector.shape_cast %7 : vector<128xf32> to vector<1x128xf32>
    %9 = math.log %8 : vector<1x128xf32>
    %10 = arith.addf %3, %9 : vector<1x128xf32>
    %11 = tpu.iota {dimensions = array<i32: 0>} : vector<30x128xi32>
    %12 = vector.broadcast %1 : vector<1x128xi32> to vector<30x128xi32>
    %13 = arith.cmpi eq, %11, %12 : vector<30x128xi32>
    %14 = arith.extui %13 : vector<30x128xi1> to vector<30x128xi32>
    %15 = arith.sitofp %14 : vector<30x128xi32> to vector<30x128xf32>
    %16 = arith.mulf %15, %0 : vector<30x128xf32>
    %cst_4 = arith.constant dense<0.000000e+00> : vector<128xf32>
    %17 = vector.multi_reduction <add>, %16, %cst_4 [0] : vector<30x128xf32> to vector<128xf32>
    %18 = vector.shape_cast %17 : vector<128xf32> to vector<1x128xf32>
    %19 = arith.subf %18, %10 : vector<1x128xf32>
    %20 = math.exp %19 : vector<1x128xf32>
    %c0_5 = arith.constant 0 : index
    %c0_6 = arith.constant 0 : index
    %21 = vector.load %arg3[%c0_5, %c0_6] : memref<30x1xf32, #tpu.memory_space<vmem>>, vector<30x1xf32>
    %22 = vector.broadcast %21 : vector<30x1xf32> to vector<30x128xf32>
    %23 = arith.mulf %15, %22 : vector<30x128xf32>
    %cst_7 = arith.constant dense<0.000000e+00> : vector<128xf32>
    %24 = vector.multi_reduction <add>, %23, %cst_7 [0] : vector<30x128xf32> to vector<128xf32>
    %25 = vector.shape_cast %24 : vector<128xf32> to vector<1x128xf32>
    %cst_8 = arith.constant 1.000000e+00 : f32
    %26 = vector.broadcast %cst_8 : f32 to vector<1x128xf32>
    %27 = arith.subf %26, %20 : vector<1x128xf32>
    %cst_9 = arith.constant 0.000000e+00 : f32
    %28 = vector.broadcast %cst_9 : f32 to vector<1x128xf32>
    %29 = arith.maximumf %27, %28 : vector<1x128xf32>
    %cst_10 = arith.constant 1.000000e+00 : f32
    %30 = vector.broadcast %cst_10 : f32 to vector<1x128xf32>
    %31 = arith.mulf %30, %29 : vector<1x128xf32>
    %32 = arith.mulf %31, %29 : vector<1x128xf32>
    %cst_11 = arith.constant 0.000000e+00 : f32
    %33 = vector.broadcast %cst_11 : f32 to vector<1x128xf32>
    %34 = arith.subf %33, %25 : vector<1x128xf32>
    %35 = arith.mulf %34, %32 : vector<1x128xf32>
    %36 = arith.mulf %35, %19 : vector<1x128xf32>
    %c0_12 = arith.constant 0 : index
    %c0_13 = arith.constant 0 : index
    %37 = vector.load %arg4[%c0_12, %c0_13] : memref<1x128xf32, #tpu.memory_space<vmem>>, vector<1x128xf32>
    tpu.vector_store %arg4[%c0_12, %c0_13], %36 {strides = array<i32>} : memref<1x128xf32, #tpu.memory_space<vmem>>, vector<1x128xf32>,
    return
  }
  func.func @transform_0(%arg0: i32) -> (i32, i32) {
    %c0_i32 = arith.constant 0 : i32
    %c0_i32_0 = arith.constant 0 : i32
    return %c0_i32, %arg0 : i32, i32
  }
  func.func @transform_1(%arg0: i32) -> (i32, i32) {
    %c0_i32 = arith.constant 0 : i32
    %c0_i32_0 = arith.constant 0 : i32
    return %c0_i32, %arg0 : i32, i32
  }
  func.func @transform_2(%arg0: i32) -> (i32, i32) {
    %c0_i32 = arith.constant 0 : i32
    %c0_i32_0 = arith.constant 0 : i32
    %c0_i32_1 = arith.constant 0 : i32
    return %c0_i32, %c0_i32_0 : i32, i32
  }
  func.func @transform_3(%arg0: i32) -> (i32, i32) {
    %c0_i32 = arith.constant 0 : i32
    %c0_i32_0 = arith.constant 0 : i32
    return %c0_i32, %arg0 : i32, i32
  }
}

</mosaic_0001>

<bundles_post_ra>
// kernel: tpu_custom_call.1
= control target key start
LH: loop header
LB: loop body
LE: loop exit
PB: predicated region body
PF: predicated region fallthrough
CT: control target
= control target key end

     0   :  { %v199_v2 = vmov 0   ;;  %s265_s0 = inlined_call_operand.vmem [shape: f32[30,128], index: 0, kind: input, shape index: {}]   ;;  %s266_s1 = inlined_call_operand.vmem [shape: s32[1,128], index: 1, kind: input, shape index: {}]   ;;  %s267_s2 = inlined_call_operand.vmem [shape: f32[30,1], index: 2, kind: input, shape index: {}]   ;;  %s268_s3 = inlined_call_operand.hbm [shape: f32[1,128], index: 3, kind: output, shape index: {}]  }
   0x1   :  { %v96_v0 = vld [vmem:[%s267_s2 + $0x10] sm:$0xff]  ;;  %v94_v1 = vld [vmem:[%s267_s2] sm:$0xff]  ;;  %162 = vset.pattern.permute.xlu1 %v199_v2  ;;  %161 = vset.pattern.permute.xlu0 %v199_v2  ;;  %v97_v3 = vld [vmem:[%s267_s2 + $0x18] sm:$0x3f] }
   0x2   :  { %110 = vperm.xlu1 %162, %v96_v0   ;;  %100 = vperm.xlu0 %161, %v94_v1   ;;  %v95_v4 = vld [vmem:[%s267_s2 + $0x8] sm:$0xff] }
   0x3   :  { %8 = vsyncpa [#allocation3], 0  ;;  %v18_v5 = vld [vmem:[%s265_s0 + $0x18] sm:$0x3f]  ;;  %vm20_vm0 = vcmask 1045504   ;;  %v17_v6 = vld [vmem:[%s265_s0 + $0x10] sm:$0xff]  ;;  %v56_v29 = vlaneseq }
   0x4   :  { %v15_v7 = vld [vmem:[%s265_s0] sm:$0xff]  ;;  %v21_v8 = vsel %vm20_vm0, %v18_v5, -inf  ;;  %v16_v9 = vld [vmem:[%s265_s0 + $0x8] sm:$0xff]  ;;  %v200_v42 = vmov 0.0  }
   0x5   :  { %v23_v10 = vmax.f32 %v17_v6, %v21_v8  ;;  %v22_v11 = vmax.f32 %v15_v7, %v16_v9  ;;  %v57_v33 = vshrl.u32 %v56_v29, 7  ;;  %v153_v37 = vld [vmem:[%s266_s1] ss:$0 sm:$0xff]  ;;  %s201_s1 = smov [#allocation2]  }
   0x6   :  { %115 = vperm.xlu1 %162, %v97_v3   ;;  %105 = vperm.xlu0 %161, %v95_v4   ;;  %s145_s28 = sshll.u32 %s201_s1, 4  ;;  %s146_s28 = int_to_ptr.vmem [resolvable:$true] %s145_s28 }
   0x7   :  { %v24_v12 = vmax.f32 %v22_v11, %v23_v10  ;;  %v58_v36 = vadd.s32 8, %v57_v33  ;;  %v59_v39 = vadd.s32 16, %v57_v33  ;;  %vm65_vm1 = vcmp.eq.s32.totalorder %v57_v33, %v153_v37  ;;  %s175_s29 = scalar_lea.vmem %s146_s28, 16  ;;  %s179_s30 = scalar_lea.vmem %s146_s28, 32 }
   0x8   :  { %v60_v40 = vadd.s32 24, %v57_v33  ;;  %v154_v43 = vsel %vm65_vm1, 1.0, %v200_v42  ;;  %p176_p0 = scmp.ne.s32.totalorder %s146_s28, %s175_s29  ;;  %p180_p1 = scmp.lt.s32.totalorder %s146_s28, %s146_s28 }
   0x9   :  { %v25_v13 = vrot.slane %v24_v12, 4  ;;  %vm66_vm2 = vcmp.eq.s32.totalorder %v58_v36, %v153_v37  ;;  %vm67_vm3 = vcmp.eq.s32.totalorder %v59_v39, %v153_v37  ;;  %v77_v46 = vmul.f32 %v154_v43, %v15_v7  ;;  %p181_p2 = scmp.lt.s32.totalorder %s179_s30, %s175_s29 }
   0xa   :  { %v155_v44 = vsel %vm66_vm2, 1.0, %v200_v42  ;;  %vm68_vm4 = vcmp.eq.s32.totalorder %v60_v40, %v153_v37  ;;  %v156_v48 = vsel %vm67_vm3, 1.0, %v200_v42 }
   0xb   :  { %v26_v14 = vmax.f32 %v24_v12, %v25_v13  ;;  %v78_v47 = vmul.f32 %v155_v44, %v16_v9  ;;  %v157_v49 = vsel %vm68_vm4, 1.0, %v200_v42  ;;  %v79_v51 = vmul.f32 %v156_v48, %v17_v6  ;;  %p182_p3 = por %p181_p2, %p180_p1 }
   0xc   :  { %v80_v53 = vmul.f32 %v157_v49, %v18_v5 }
   0xd   :  { %v27_v15 = vrot.slane %v26_v14, 2  ;;  %v81_v52 = vadd.f32 %v78_v47, %v77_v46  ;;  %p183_p4 = pnand %p182_p3, %p176_p0 }
   0xe   :  { %v83_v56 = vsel %vm20_vm0, %v80_v53, 0.0 }
   0xf   :  { %v28_v16 = vmax.f32 %v26_v14, %v27_v15  ;;  %v82_v55 = vadd.f32 %v81_v52, %v79_v51 }
  0x11   :  { %v29_v17 = vrot.slane %v28_v16, 1  ;;  %v84_v58 = vadd.f32 %v83_v56, %v82_v55 }
  0x13   :  { %v30_v18 = vmax.f32 %v28_v16, %v29_v17  ;;  %v85_v60 = vrot.slane %v84_v58, 4 }
  0x15   :  { %v31_v19 = vsub.f32 %v15_v7, %v30_v18  ;;  %v32_v20 = vsub.f32 %v16_v9, %v30_v18  ;;  %v33_v22 = vsub.f32 %v17_v6, %v30_v18  ;;  %v34_v24 = vsub.f32 %v18_v5, %v30_v18 }
  0x16   :  { %v86_v61 = vadd.f32 %v85_v60, %v84_v58 }
  0x17   :  { %v35_v21 = vmul.f32 1.442695, %v31_v19  ;;  %v37_v23 = vmul.f32 1.442695, %v32_v20  ;;  %v39_v25 = vmul.f32 1.442695, %v33_v22 }
  0x18   :  { %v41_v26 = vmul.f32 1.442695, %v34_v24  ;;  %v87_v62 = vrot.slane %v86_v61, 2 }
  0x19   :  { %163 = vpow2.f32 %v35_v21 }
  0x1a   :  { %165 = vpow2.f32 %v37_v23  ;;  %v88_v63 = vadd.f32 %v87_v62, %v86_v61 }
  0x1b   :  { %167 = vpow2.f32 %v39_v25 }
  0x1c   :  { %169 = vpow2.f32 %v41_v26  ;;  %v89_v2 = vrot.slane %v88_v63, 1 }
  0x1e   :  { %v90_v4 = vadd.f32 %v89_v2, %v88_v63 }
  0x23   :  { %v164_v27 = vpop.eup %163 }
  0x24   :  { %v166_v28 = vpop.eup %165 }
  0x25   :  { %v43_v30 = vadd.f32 %v166_v28, %v164_v27  ;;  %v168_v31 = vpop.eup %167 }
  0x26   :  { %v170_v32 = vpop.eup %169 }
  0x27   :  { %v44_v34 = vadd.f32 %v168_v31, %v43_v30  ;;  %v45_v35 = vsel %vm20_vm0, %v170_v32, 0.0 }
  0x29   :  { %v46_v38 = vadd.f32 %v45_v35, %v44_v34 }
  0x2b   :  { %v47_v41 = vrot.slane %v46_v38, 4 }
  0x2d   :  { %v48_v45 = vadd.f32 %v47_v41, %v46_v38 }
  0x2f   :  { %v49_v50 = vrot.slane %v48_v45, 2 }
  0x31   :  { %v50_v54 = vadd.f32 %v49_v50, %v48_v45 }
  0x33   :  { %v51_v57 = vrot.slane %v50_v54, 1 }
  0x35   :  { %v52_v59 = vadd.f32 %v51_v57, %v50_v54 }
  0x37   :  { %171 = vlog2.f32 %v52_v59 }
  0x41   :  { %v172_v0 = vpop.eup %171 }
  0x42   :  { %v54_v1 = vmul.f32 0.6931472, %v172_v0 }
  0x44   :  { %v55_v3 = vadd.f32 %v54_v1, %v30_v18 }
  0x46   :  { %v91_v6 = vsub.f32 %v90_v4, %v55_v3 }
  0x48   :  { %v92_v7 = vmul.f32 1.442695, %v91_v6 }
  0x4a   :  { %173 = vpow2.f32 %v92_v7 }
  0x54   :  { %v174_v20 = vpop.eup %173 }
  0x55   :  { %v132_v22 = vsub.f32 1.0, %v174_v20 }
  0x57   :  { %v133_v25 = vmax.f32 %v132_v22, 0.0 }
  0x59   :  { %v134_v28 = vmul.f32 %v133_v25, %v133_v25 }
  0x81   :  { %v111_v5 = vpop.permute.xlu1 %110  ;;  %v101_v8 = vpop.permute.xlu0 %100 }
  0x82   :  { %v118_v11 = vmul.f32 %v154_v43, %v101_v8  ;;  %v120_v14 = vmul.f32 %v156_v48, %v111_v5 }
  0x85   :  { %v116_v9 = vpop.permute.xlu1 %115  ;;  %v106_v10 = vpop.permute.xlu0 %105 }
  0x86   :  { %v119_v12 = vmul.f32 %v155_v44, %v106_v10  ;;  %v121_v13 = vmul.f32 %v157_v49, %v116_v9 }
  0x88   :  { %v122_v15 = vadd.f32 %v119_v12, %v118_v11  ;;  %v124_v17 = vsel %vm20_vm0, %v121_v13, 0.0 }
  0x8a   :  { %v123_v16 = vadd.f32 %v122_v15, %v120_v14 }
  0x8c   :  { %v125_v19 = vadd.f32 %v124_v17, %v123_v16 }
  0x8e   :  { %v126_v21 = vrot.slane %v125_v19, 4 }
  0x90   :  { %v127_v18 = vadd.f32 %v126_v21, %v125_v19 }
  0x92   :  { %v128_v23 = vrot.slane %v127_v18, 2 }
  0x94   :  { %v129_v24 = vadd.f32 %v128_v23, %v127_v18 }
  0x96   :  { %v130_v26 = vrot.slane %v129_v24, 1 }
  0x98   :  { %v131_v27 = vadd.f32 %v130_v26, %v129_v24 }
  0x9a   :  { %v135_v29 = vsub.f32 0.0, %v131_v27 }
  0x9c   :  { %v136_v30 = vmul.f32 %v135_v29, %v134_v28 }
  0x9e   :  { %v137_v31 = vmul.f32 %v136_v30, %v91_v6 }
  0xa0   :  { %138 = vst [vmem:[#allocation2] sm:$0x1] %v137_v31 }
  0xa1   :  { %186 = shalt.err (!%p183_p4)
}
  0xa2   :  { %s187_s6 = scalar_lea.hbm %s268_s3, 16 }
  0xa3   :  { %p188_p5 = scmp.ne.s32.totalorder %s268_s3, %s187_s6  ;;  %p191_p6 = scmp.lt.u32.totalorder %s187_s6, %s268_s3 }
  0xa5   :  { %p193_p7 = pnand %p191_p6, %p188_p5 }
  0xa7   :  { %196 = shalt.err (!%p193_p7)
}
  0xa8   :  { %148 = dma.vmem_to_hbm [thread:$0]  %s146_s28, 16, %s268_s3, [#allocation3]  }
  0xa9   :  { %197 = dma.done.wait [#allocation3], 16  }
  0xaa   :  { %198 = vsyncadd [#allocation3], 4294967280 }
  0xab   :  { %152 = vsyncpa [#allocation3], 1 }

</bundles_post_ra>
